<compile_context>
chip_gen: v7x
topology: tpu7x:2x2x1
jax: 0.10.0
libtpu: 0.0.40
codegen_flags: <defaults>
</compile_context>

<pallas_src>
import jax
import jax.numpy as jnp
from jax.experimental import pallas as pl
from jax.experimental.pallas import tpu as pltpu


def _round_up(x, m):
    return (x + m - 1) // m * m


# ----------------------------------------------------------------------------
# Fused forward kernel
# ----------------------------------------------------------------------------
def _vae_fwd_kernel(x_ref, eps_ref,
                    w1_ref, b1_ref,
                    wmu_ref, bmu_ref,
                    wlv_ref, blv_ref,
                    wd_ref, bd_ref,
                    wo_ref, bo_ref,
                    out_ref, mu_ref, lv_ref):
    x = x_ref[...]

    # z1 = relu(x @ W1 + b1)
    z1 = jnp.dot(x, w1_ref[...], preferred_element_type=jnp.float32) + b1_ref[...]
    z1 = jnp.maximum(z1, 0.0)

    # encoder heads
    mu = jnp.dot(z1, wmu_ref[...], preferred_element_type=jnp.float32) + bmu_ref[...]
    lv = jnp.dot(z1, wlv_ref[...], preferred_element_type=jnp.float32) + blv_ref[...]

    # reparameterize: z2 = eps * exp(0.5 * logvar) + mu
    z2 = eps_ref[...] * jnp.exp(0.5 * lv) + mu

    # decoder
    mid = jnp.dot(z2, wd_ref[...], preferred_element_type=jnp.float32) + bd_ref[...]
    mid = jnp.maximum(mid, 0.0)
    out = jnp.dot(mid, wo_ref[...], preferred_element_type=jnp.float32) + bo_ref[...]
    out = jax.nn.sigmoid(out)

    out_ref[...] = out
    mu_ref[...] = mu
    lv_ref[...] = lv


# ----------------------------------------------------------------------------
# Wrapper
# ----------------------------------------------------------------------------
def vae_forward(params, state, eps):
    """state: (B, ...) with prod(...) == width*height.  eps: (B, n_hidden).

    Returns (out shaped like state, mu, logvar) — same as the PyTorch module.
    """
    orig_shape = state.shape
    B = orig_shape[0]
    x = state.reshape(B, -1).astype(jnp.float32)
    D = x.shape[1]
    M = params["w1"].shape[1]
    H = params["wmu"].shape[1]
    eps = eps.astype(jnp.float32)

    # Batch tiling: sublane-aligned row blocks, grid axis "parallel" (megacore).
    block_b = min(256, _round_up(B, 8))
    Bp = _round_up(B, block_b)
    if Bp != B:
        x = jnp.pad(x, ((0, Bp - B), (0, 0)))
        eps = jnp.pad(eps, ((0, Bp - B), (0, 0)))
    grid = (Bp // block_b,)

    def rows(n):  # per-grid-step batch tile
        return pl.BlockSpec((block_b, n), lambda i: (i, 0))

    def resident(shape):  # weights/biases: same block every step -> VMEM resident
        return pl.BlockSpec(shape, lambda i: (0, 0))

    out, mu, lv = pl.pallas_call(
        _vae_fwd_kernel,
        out_shape=(jax.ShapeDtypeStruct((Bp, D), jnp.float32),
                   jax.ShapeDtypeStruct((Bp, H), jnp.float32),
                   jax.ShapeDtypeStruct((Bp, H), jnp.float32)),
        grid=grid,
        in_specs=[rows(D), rows(H),
                  resident((D, M)), resident((1, M)),
                  resident((M, H)), resident((1, H)),
                  resident((M, H)), resident((1, H)),
                  resident((H, M)), resident((1, M)),
                  resident((M, D)), resident((1, D))],
        out_specs=(rows(D), rows(H), rows(H)),
        compiler_params=pltpu.CompilerParams(
            dimension_semantics=("parallel",)),
    )(x, eps,
      params["w1"], params["b1"],
      params["wmu"], params["bmu"],
      params["wlv"], params["blv"],
      params["wd"], params["bd"],
      params["wo"], params["bo"])

    out = out[:B].reshape(orig_shape)
    return out, mu[:B], lv[:B]


# ----------------------------------------------------------------------------
# Parameter init (PyTorch nn.Linear-style uniform bounds; weights stored
# pre-transposed as (in_features, out_features) so the kernel never transposes)
# ----------------------------------------------------------------------------
def _linear_init(key, fan_in, fan_out):
    kw, kb = jax.random.split(key)
    bound = 1.0 / jnp.sqrt(jnp.float32(fan_in))
    w = jax.random.uniform(kw, (fan_in, fan_out), jnp.float32, -bound, bound)
    b = jax.random.uniform(kb, (1, fan_out), jnp.float32, -bound, bound)
    return w, b


def init_params(key, width, height, n_middle, n_hidden=10):
    D = width * height
    k1, k2, k3, k4, k5 = jax.random.split(key, 5)
    w1, b1 = _linear_init(k1, D, n_middle)          # fullyConnected
    wmu, bmu = _linear_init(k2, n_middle, n_hidden)  # encoderMean
    wlv, blv = _linear_init(k3, n_middle, n_hidden)  # encoderStDev
    wd, bd = _linear_init(k4, n_hidden, n_middle)    # decodeFc
    wo, bo = _linear_init(k5, n_middle, D)           # decoderOut
    return {"w1": w1, "b1": b1, "wmu": wmu, "bmu": bmu,
            "wlv": wlv, "blv": blv, "wd": wd, "bd": bd,
            "wo": wo, "bo": bo}


# ----------------------------------------------------------------------------
# Pure-JAX reference (same math, HIGHEST precision) for a correctness check
# ----------------------------------------------------------------------------
def vae_forward_ref(params, state, eps):
    B = state.shape[0]
    x = state.reshape(B, -1).astype(jnp.float32)
    hp = jax.lax.Precision.HIGHEST
    z1 = jax.nn.relu(jnp.dot(x, params["w1"], precision=hp) + params["b1"])
    mu = jnp.dot(z1, params["wmu"], precision=hp) + params["bmu"]
    lv = jnp.dot(z1, params["wlv"], precision=hp) + params["blv"]
    z2 = eps * jnp.exp(0.5 * lv) + mu
    mid = jax.nn.relu(jnp.dot(z2, params["wd"], precision=hp) + params["bd"])
    out = jax.nn.sigmoid(jnp.dot(mid, params["wo"], precision=hp) + params["bo"])
    return out.reshape(state.shape), mu, lv


# ----------------------------------------------------------------------------
if __name__ == "__main__":
    B, width, height = 2, 16, 16
    n_middle, n_hidden = 128, 10

    key = jax.random.PRNGKey(0)
    kp, ks, ke = jax.random.split(key, 3)
    params = init_params(kp, width, height, n_middle, n_hidden)
    state = jax.random.uniform(ks, (B, width, height), jnp.float32)
    # reparameterization noise (torch.randn_like equivalent), passed in for determinism
    eps = jax.random.normal(ke, (B, n_hidden), jnp.float32)

    fwd = jax.jit(vae_forward)
    out, mu, logvar = fwd(params, state, eps)
    jax.block_until_ready((out, mu, logvar))

    ref_out, ref_mu, ref_lv = vae_forward_ref(params, state, eps)
    assert out.shape == state.shape
    assert mu.shape == (B, n_hidden) and logvar.shape == (B, n_hidden)
    assert bool(jnp.all((out >= 0.0) & (out <= 1.0)))
    assert bool(jnp.allclose(out, ref_out, atol=2e-3, rtol=2e-3))
    assert bool(jnp.allclose(mu, ref_mu, atol=2e-3, rtol=2e-3))
    assert bool(jnp.allclose(logvar, ref_lv, atol=2e-3, rtol=2e-3))
    print("KERNEL_OK")
</pallas_src>

<mosaic_0001>
module attributes {stable_mosaic.version = 11 : i64} {
  func.func @_vae_fwd_kernel(%arg0: i32, %arg1: memref<8x256xf32, #tpu.memory_space<vmem>>, %arg2: memref<8x10xf32, #tpu.memory_space<vmem>>, %arg3: memref<256x128xf32, #tpu.memory_space<vmem>>, %arg4: memref<1x128xf32, #tpu.memory_space<vmem>>, %arg5: memref<128x10xf32, #tpu.memory_space<vmem>>, %arg6: memref<1x10xf32, #tpu.memory_space<vmem>>, %arg7: memref<128x10xf32, #tpu.memory_space<vmem>>, %arg8: memref<1x10xf32, #tpu.memory_space<vmem>>, %arg9: memref<10x128xf32, #tpu.memory_space<vmem>>, %arg10: memref<1x128xf32, #tpu.memory_space<vmem>>, %arg11: memref<128x256xf32, #tpu.memory_space<vmem>>, %arg12: memref<1x256xf32, #tpu.memory_space<vmem>>, %arg13: memref<8x256xf32, #tpu.memory_space<vmem>>, %arg14: memref<8x10xf32, #tpu.memory_space<vmem>>, %arg15: memref<8x10xf32, #tpu.memory_space<vmem>>) attributes {dimension_semantics = [#tpu.dimension_semantics<parallel>], iteration_bounds = array<i64: 1>, scalar_prefetch = 0 : i64, scratch_operands = 0 : i64, tpu.core_type = #tpu.core_type<tc>, window_params = [{transform_indices = @transform_0, window_bounds = array<i64: 8, 256>}, {transform_indices = @transform_1, window_bounds = array<i64: 8, 10>}, {pipeline_mode = #tpu.pipeline_mode<synchronous>, transform_indices = @transform_2, window_bounds = array<i64: 256, 128>}, {pipeline_mode = #tpu.pipeline_mode<synchronous>, transform_indices = @transform_3, window_bounds = array<i64: 1, 128>}, {pipeline_mode = #tpu.pipeline_mode<synchronous>, transform_indices = @transform_4, window_bounds = array<i64: 128, 10>}, {pipeline_mode = #tpu.pipeline_mode<synchronous>, transform_indices = @transform_5, window_bounds = array<i64: 1, 10>}, {pipeline_mode = #tpu.pipeline_mode<synchronous>, transform_indices = @transform_6, window_bounds = array<i64: 128, 10>}, {pipeline_mode = #tpu.pipeline_mode<synchronous>, transform_indices = @transform_7, window_bounds = array<i64: 1, 10>}, {pipeline_mode = #tpu.pipeline_mode<synchronous>, transform_indices = @transform_8, window_bounds = array<i64: 10, 128>}, {pipeline_mode = #tpu.pipeline_mode<synchronous>, transform_indices = @transform_9, window_bounds = array<i64: 1, 128>}, {pipeline_mode = #tpu.pipeline_mode<synchronous>, transform_indices = @transform_10, window_bounds = array<i64: 128, 256>}, {pipeline_mode = #tpu.pipeline_mode<synchronous>, transform_indices = @transform_11, window_bounds = array<i64: 1, 256>}, {transform_indices = @transform_12, window_bounds = array<i64: 8, 256>}, {transform_indices = @transform_13, window_bounds = array<i64: 8, 10>}, {transform_indices = @transform_14, window_bounds = array<i64: 8, 10>}]} {
    %c0 = arith.constant 0 : index
    %c0_0 = arith.constant 0 : index
    %0 = vector.load %arg1[%c0, %c0_0] : memref<8x256xf32, #tpu.memory_space<vmem>>, vector<8x256xf32>
    %c0_1 = arith.constant 0 : index
    %c0_2 = arith.constant 0 : index
    %1 = vector.load %arg3[%c0_1, %c0_2] : memref<256x128xf32, #tpu.memory_space<vmem>>, vector<256x128xf32>
    %cst = arith.constant dense<0.000000e+00> : vector<8x128xf32>
    %2 = tpu.matmul %0, %1, %cst {dimension_numbers = #tpu.dot_dimension_numbers<[1], [0], [0], [1], [0, 0, 1, 1], [], []>} : vector<8x256xf32>, vector<256x128xf32>, vector<8x128xf32> -> vector<8x128xf32>
    %c0_3 = arith.constant 0 : index
    %c0_4 = arith.constant 0 : index
    %3 = vector.load %arg4[%c0_3, %c0_4] : memref<1x128xf32, #tpu.memory_space<vmem>>, vector<1x128xf32>
    %4 = vector.broadcast %3 : vector<1x128xf32> to vector<8x128xf32>
    %5 = arith.addf %2, %4 : vector<8x128xf32>
    %cst_5 = arith.constant 0.000000e+00 : f32
    %6 = vector.broadcast %cst_5 : f32 to vector<8x128xf32>
    %7 = arith.maximumf %5, %6 : vector<8x128xf32>
    %c0_6 = arith.constant 0 : index
    %c0_7 = arith.constant 0 : index
    %8 = vector.load %arg5[%c0_6, %c0_7] : memref<128x10xf32, #tpu.memory_space<vmem>>, vector<128x10xf32>
    %cst_8 = arith.constant dense<0.000000e+00> : vector<8x10xf32>
    %9 = tpu.matmul %7, %8, %cst_8 {dimension_numbers = #tpu.dot_dimension_numbers<[1], [0], [0], [1], [0, 0, 1, 1], [], []>} : vector<8x128xf32>, vector<128x10xf32>, vector<8x10xf32> -> vector<8x10xf32>
    %c0_9 = arith.constant 0 : index
    %c0_10 = arith.constant 0 : index
    %10 = vector.load %arg6[%c0_9, %c0_10] : memref<1x10xf32, #tpu.memory_space<vmem>>, vector<1x10xf32>
    %11 = vector.broadcast %10 : vector<1x10xf32> to vector<8x10xf32>
    %12 = arith.addf %9, %11 : vector<8x10xf32>
    %c0_11 = arith.constant 0 : index
    %c0_12 = arith.constant 0 : index
    %13 = vector.load %arg7[%c0_11, %c0_12] : memref<128x10xf32, #tpu.memory_space<vmem>>, vector<128x10xf32>
    %cst_13 = arith.constant dense<0.000000e+00> : vector<8x10xf32>
    %14 = tpu.matmul %7, %13, %cst_13 {dimension_numbers = #tpu.dot_dimension_numbers<[1], [0], [0], [1], [0, 0, 1, 1], [], []>} : vector<8x128xf32>, vector<128x10xf32>, vector<8x10xf32> -> vector<8x10xf32>
    %c0_14 = arith.constant 0 : index
    %c0_15 = arith.constant 0 : index
    %15 = vector.load %arg8[%c0_14, %c0_15] : memref<1x10xf32, #tpu.memory_space<vmem>>, vector<1x10xf32>
    %16 = vector.broadcast %15 : vector<1x10xf32> to vector<8x10xf32>
    %17 = arith.addf %14, %16 : vector<8x10xf32>
    %c0_16 = arith.constant 0 : index
    %c0_17 = arith.constant 0 : index
    %18 = vector.load %arg2[%c0_16, %c0_17] : memref<8x10xf32, #tpu.memory_space<vmem>>, vector<8x10xf32>
    %cst_18 = arith.constant 5.000000e-01 : f32
    %19 = vector.broadcast %cst_18 : f32 to vector<8x10xf32>
    %20 = arith.mulf %19, %17 : vector<8x10xf32>
    %21 = math.exp %20 : vector<8x10xf32>
    %22 = arith.mulf %18, %21 : vector<8x10xf32>
    %23 = arith.addf %22, %12 : vector<8x10xf32>
    %c0_19 = arith.constant 0 : index
    %c0_20 = arith.constant 0 : index
    %24 = vector.load %arg9[%c0_19, %c0_20] : memref<10x128xf32, #tpu.memory_space<vmem>>, vector<10x128xf32>
    %cst_21 = arith.constant dense<0.000000e+00> : vector<8x128xf32>
    %25 = tpu.matmul %23, %24, %cst_21 {dimension_numbers = #tpu.dot_dimension_numbers<[1], [0], [0], [1], [0, 0, 1, 1], [], []>} : vector<8x10xf32>, vector<10x128xf32>, vector<8x128xf32> -> vector<8x128xf32>
    %c0_22 = arith.constant 0 : index
    %c0_23 = arith.constant 0 : index
    %26 = vector.load %arg10[%c0_22, %c0_23] : memref<1x128xf32, #tpu.memory_space<vmem>>, vector<1x128xf32>
    %27 = vector.broadcast %26 : vector<1x128xf32> to vector<8x128xf32>
    %28 = arith.addf %25, %27 : vector<8x128xf32>
    %cst_24 = arith.constant 0.000000e+00 : f32
    %29 = vector.broadcast %cst_24 : f32 to vector<8x128xf32>
    %30 = arith.maximumf %28, %29 : vector<8x128xf32>
    %c0_25 = arith.constant 0 : index
    %c0_26 = arith.constant 0 : index
    %31 = vector.load %arg11[%c0_25, %c0_26] : memref<128x256xf32, #tpu.memory_space<vmem>>, vector<128x256xf32>
    %cst_27 = arith.constant dense<0.000000e+00> : vector<8x256xf32>
    %32 = tpu.matmul %30, %31, %cst_27 {dimension_numbers = #tpu.dot_dimension_numbers<[1], [0], [0], [1], [0, 0, 1, 1], [], []>} : vector<8x128xf32>, vector<128x256xf32>, vector<8x256xf32> -> vector<8x256xf32>
    %c0_28 = arith.constant 0 : index
    %c0_29 = arith.constant 0 : index
    %33 = vector.load %arg12[%c0_28, %c0_29] : memref<1x256xf32, #tpu.memory_space<vmem>>, vector<1x256xf32>
    %34 = vector.broadcast %33 : vector<1x256xf32> to vector<8x256xf32>
    %35 = arith.addf %32, %34 : vector<8x256xf32>
    %36 = arith.negf %35 : vector<8x256xf32>
    %37 = math.exp %36 : vector<8x256xf32>
    %cst_30 = arith.constant 1.000000e+00 : f32
    %38 = vector.broadcast %cst_30 : f32 to vector<8x256xf32>
    %39 = arith.addf %38, %37 : vector<8x256xf32>
    %40 = arith.divf %38, %39 : vector<8x256xf32>
    %c0_31 = arith.constant 0 : index
    %c0_32 = arith.constant 0 : index
    %41 = vector.load %arg13[%c0_31, %c0_32] : memref<8x256xf32, #tpu.memory_space<vmem>>, vector<8x256xf32>
    tpu.vector_store %arg13[%c0_31, %c0_32], %40 {strides = array<i32>} : memref<8x256xf32, #tpu.memory_space<vmem>>, vector<8x256xf32>,
    %c0_33 = arith.constant 0 : index
    %c0_34 = arith.constant 0 : index
    %42 = vector.load %arg14[%c0_33, %c0_34] : memref<8x10xf32, #tpu.memory_space<vmem>>, vector<8x10xf32>
    tpu.vector_store %arg14[%c0_33, %c0_34], %12 {strides = array<i32>} : memref<8x10xf32, #tpu.memory_space<vmem>>, vector<8x10xf32>,
    %c0_35 = arith.constant 0 : index
    %c0_36 = arith.constant 0 : index
    %43 = vector.load %arg15[%c0_35, %c0_36] : memref<8x10xf32, #tpu.memory_space<vmem>>, vector<8x10xf32>
    tpu.vector_store %arg15[%c0_35, %c0_36], %17 {strides = array<i32>} : memref<8x10xf32, #tpu.memory_space<vmem>>, vector<8x10xf32>,
    return
  }
  func.func @transform_0(%arg0: i32) -> (i32, i32) {
    %c0_i32 = arith.constant 0 : i32
    %c0_i32_0 = arith.constant 0 : i32
    return %arg0, %c0_i32 : i32, i32
  }
  func.func @transform_1(%arg0: i32) -> (i32, i32) {
    %c0_i32 = arith.constant 0 : i32
    %c0_i32_0 = arith.constant 0 : i32
    return %arg0, %c0_i32 : i32, i32
  }
  func.func @transform_2(%arg0: i32) -> (i32, i32) {
    %c0_i32 = arith.constant 0 : i32
    %c0_i32_0 = arith.constant 0 : i32
    %c0_i32_1 = arith.constant 0 : i32
    return %c0_i32, %c0_i32_0 : i32, i32
  }
  func.func @transform_3(%arg0: i32) -> (i32, i32) {
    %c0_i32 = arith.constant 0 : i32
    %c0_i32_0 = arith.constant 0 : i32
    %c0_i32_1 = arith.constant 0 : i32
    return %c0_i32, %c0_i32_0 : i32, i32
  }
  func.func @transform_4(%arg0: i32) -> (i32, i32) {
    %c0_i32 = arith.constant 0 : i32
    %c0_i32_0 = arith.constant 0 : i32
    %c0_i32_1 = arith.constant 0 : i32
    return %c0_i32, %c0_i32_0 : i32, i32
  }
  func.func @transform_5(%arg0: i32) -> (i32, i32) {
    %c0_i32 = arith.constant 0 : i32
    %c0_i32_0 = arith.constant 0 : i32
    %c0_i32_1 = arith.constant 0 : i32
    return %c0_i32, %c0_i32_0 : i32, i32
  }
  func.func @transform_6(%arg0: i32) -> (i32, i32) {
    %c0_i32 = arith.constant 0 : i32
    %c0_i32_0 = arith.constant 0 : i32
    %c0_i32_1 = arith.constant 0 : i32
    return %c0_i32, %c0_i32_0 : i32, i32
  }
  func.func @transform_7(%arg0: i32) -> (i32, i32) {
    %c0_i32 = arith.constant 0 : i32
    %c0_i32_0 = arith.constant 0 : i32
    %c0_i32_1 = arith.constant 0 : i32
    return %c0_i32, %c0_i32_0 : i32, i32
  }
  func.func @transform_8(%arg0: i32) -> (i32, i32) {
    %c0_i32 = arith.constant 0 : i32
    %c0_i32_0 = arith.constant 0 : i32
    %c0_i32_1 = arith.constant 0 : i32
    return %c0_i32, %c0_i32_0 : i32, i32
  }
  func.func @transform_9(%arg0: i32) -> (i32, i32) {
    %c0_i32 = arith.constant 0 : i32
    %c0_i32_0 = arith.constant 0 : i32
    %c0_i32_1 = arith.constant 0 : i32
    return %c0_i32, %c0_i32_0 : i32, i32
  }
  func.func @transform_10(%arg0: i32) -> (i32, i32) {
    %c0_i32 = arith.constant 0 : i32
    %c0_i32_0 = arith.constant 0 : i32
    %c0_i32_1 = arith.constant 0 : i32
    return %c0_i32, %c0_i32_0 : i32, i32
  }
  func.func @transform_11(%arg0: i32) -> (i32, i32) {
    %c0_i32 = arith.constant 0 : i32
    %c0_i32_0 = arith.constant 0 : i32
    %c0_i32_1 = arith.constant 0 : i32
    return %c0_i32, %c0_i32_0 : i32, i32
  }
  func.func @transform_12(%arg0: i32) -> (i32, i32) {
    %c0_i32 = arith.constant 0 : i32
    %c0_i32_0 = arith.constant 0 : i32
    return %arg0, %c0_i32 : i32, i32
  }
  func.func @transform_13(%arg0: i32) -> (i32, i32) {
    %c0_i32 = arith.constant 0 : i32
    %c0_i32_0 = arith.constant 0 : i32
    return %arg0, %c0_i32 : i32, i32
  }
  func.func @transform_14(%arg0: i32) -> (i32, i32) {
    %c0_i32 = arith.constant 0 : i32
    %c0_i32_0 = arith.constant 0 : i32
    return %arg0, %c0_i32 : i32, i32
  }
}

</mosaic_0001>

<bundles_post_ra>
// kernel: vae_forward.1
= control target key start
LH: loop header
LB: loop body
LE: loop exit
PB: predicated region body
PF: predicated region fallthrough
CT: control target
= control target key end

     0   :  { %20 = vsyncpa [#allocation3], 0  ;;  %s908_s29 = smov [#allocation2]   ;;  %s1256_s0 = inlined_call_operand.vmem [shape: f32[8,256], index: 0, kind: input, shape index: {}]   ;;  %s1257_s1 = inlined_call_operand.vmem [shape: f32[8,10], index: 1, kind: input, shape index: {}]   ;;  %s1258_s2 = inlined_call_operand.vmem [shape: f32[256,128], index: 2, kind: input, shape index: {}]   ;;  %s1259_s3 = inlined_call_operand.vmem [shape: f32[1,128], index: 3, kind: input, shape index: {}]   ;;  %s1260_s4 = inlined_call_operand.vmem [shape: f32[128,10], index: 4, kind: input, shape index: {}]   ;;  %s1261_s5 = inlined_call_operand.vmem [shape: f32[1,10], index: 5, kind: input, shape index: {}]   ;;  %s1262_s6 = inlined_call_operand.vmem [shape: f32[128,10], index: 6, kind: input, shape index: {}]   ;;  %s1263_s7 = inlined_call_operand.vmem [shape: f32[1,10], index: 7, kind: input, shape index: {}]   ;;  %s1264_s8 = inlined_call_operand.vmem [shape: f32[10,128], index: 8, kind: input, shape index: {}]   ;;  %s1265_s9 = inlined_call_operand.vmem [shape: f32[1,128], index: 9, kind: input, shape index: {}]   ;;  %s1266_s10 = inlined_call_operand.hbm [shape: f32[128,256], index: 10, kind: input, shape index: {}]   ;;  %s1267_s11 = inlined_call_operand.vmem [shape: f32[1,256], index: 11, kind: input, shape index: {}]   ;;  %s1268_s12 = inlined_call_operand.vmem [shape: f32[8,256], index: 12, kind: output, shape index: {0}]   ;;  %s1269_s13 = inlined_call_operand.vmem [shape: f32[8,10], index: 13, kind: output, shape index: {1}]   ;;  %s1270_s14 = inlined_call_operand.vmem [shape: f32[8,10], index: 14, kind: output, shape index: {2}]  }
   0x1   :  { %s46_s30 = sshll.u32 %s908_s29, 4  ;;  %s884_s17 = scalar_lea.hbm %s1266_s10, 4096  ;;  %s47_s30 = int_to_ptr.vmem [resolvable:$true] %s46_s30 }
   0x2   :  { %p885_p0 = scmp.ne.s32.totalorder %s1266_s10, %s884_s17  ;;  %p888_p1 = scmp.lt.u32.totalorder %s884_s17, %s1266_s10 }
   0x4   :  { %p890_p2 = pnand %p888_p1, %p885_p0 }
   0x6   :  { %893 = shalt.err (!%p890_p2)
}
   0x7   :  { %s894_s22 = scalar_lea.vmem %s47_s30, 4096  ;;  %p899_p4 = scmp.lt.s32.totalorder %s47_s30, %s47_s30 }
   0x8   :  { %p895_p3 = scmp.ne.s32.totalorder %s47_s30, %s894_s22  ;;  %p900_p5 = scmp.lt.s32.totalorder %s894_s22, %s894_s22 }
   0xa   :  { %p901_p6 = por %p900_p5, %p899_p4 }
   0xc   :  { %p902_p7 = pnand %p901_p6, %p895_p3 }
   0xe   :  { %905 = shalt.err (!%p902_p7)
}
   0xf   :  { %s909_s23 = smov 256   ;;  %s910_s24 = smov 16  }
  0x10   :  { %52 = dma.hbm_to_vmem [thread:$0]  %s1266_s10, 4096, %s47_s30, [#allocation3], %s909_s23, %s909_s23, %s910_s24  }
  0x11   :  { %906 = dma.done.wait [#allocation3], 4096  }
  0x12   :  { %907 = vsyncadd [#allocation3], 4294963200  ;;  %v911_v0 = vmov 0.0|0.0   ;;  %v76_v1 = vld [vmem:[%s1258_s2 + $0x80] sm:$0xff]  ;;  %v77_v2 = vld [vmem:[%s1258_s2 + $0x88] sm:$0xff]  ;;  %vm912_vm0 = vmmov 0  }
  0x13   :  { %783 = vmatprep.subr.bf16.mxu1 %v911_v0  ;;  %v60_v3 = vld [vmem:[%s1258_s2] sm:$0xff]  ;;  %v751_v4 = vpack.c.bf16 %v77_v2, %v76_v1  ;;  %v61_v5 = vld [vmem:[%s1258_s2 + $0x8] sm:$0xff]  ;;  %v78_v6 = vld [vmem:[%s1258_s2 + $0x90] sm:$0xff]  ;;  %vm375_vm1 = vcmask 1041408   ;;  %vm914_vm2 = vmmov 1   ;;  %vm371_vm4 = vcmask 80896  }
  0x14   :  { %v79_v7 = vld [vmem:[%s1258_s2 + $0x98] sm:$0xff]  ;;  %v753_v8 = vpack.c.bf16 %v61_v5, %v60_v3  ;;  %v62_v10 = vld [vmem:[%s1258_s2 + $0x10] sm:$0xff]  ;;  %v80_v12 = vld [vmem:[%s1258_s2 + $0xa0] sm:$0xff] }
  0x15   :  { %v755_v9 = vpack.c.bf16 %v79_v7, %v78_v6  ;;  %v63_v11 = vld [vmem:[%s1258_s2 + $0x18] sm:$0xff]  ;;  %752 = vmatprep.subr.bf16.mxu0 %v751_v4  ;;  %v81_v13 = vld [vmem:[%s1258_s2 + $0xa8] sm:$0xff]  ;;  %v64_v16 = vld [vmem:[%s1258_s2 + $0x20] sm:$0xff] }
  0x16   :  { %754 = vmatpush3.bf16.msra.mxu0 %v753_v8  ;;  %v757_v14 = vpack.c.bf16 %v63_v11, %v62_v10  ;;  %v759_v15 = vpack.c.bf16 %v81_v13, %v80_v12  ;;  %v65_v17 = vld [vmem:[%s1258_s2 + $0x28] sm:$0xff]  ;;  %v82_v18 = vld [vmem:[%s1258_s2 + $0xb0] sm:$0xff]  ;;  %v83_v19 = vld [vmem:[%s1258_s2 + $0xb8] sm:$0xff] }
  0x17   :  { %756 = vmatprep.subr.bf16.mxu0 %v755_v9  ;;  %v761_v20 = vpack.c.bf16 %v65_v17, %v64_v16  ;;  %v763_v21 = vpack.c.bf16 %v83_v19, %v82_v18  ;;  %v66_v22 = vld [vmem:[%s1258_s2 + $0x30] sm:$0xff]  ;;  %v67_v23 = vld [vmem:[%s1258_s2 + $0x38] sm:$0xff]  ;;  %v84_v24 = vld [vmem:[%s1258_s2 + $0xc0] sm:$0xff] }
  0x18   :  { %v85_v25 = vld [vmem:[%s1258_s2 + $0xc8] sm:$0xff]  ;;  %v170_v27 = vld [vmem:[%s1260_s4] sm:$0xff]  ;;  %v765_v29 = vpack.c.bf16 %v67_v23, %v66_v22  ;;  %v172_v31 = vld [vmem:[%s1260_s4 + $0x10] sm:$0xff] }
  0x19   :  { %v59_v26 = vld [vmem:[%s1256_s0 + $0x8] sm:$0xff]  ;;  %v767_v32 = vpack.c.bf16 %v85_v25, %v84_v24  ;;  %v68_v33 = vld [vmem:[%s1258_s2 + $0x40] sm:$0xff]  ;;  %v173_v35 = vld [vmem:[%s1260_s4 + $0x18] sm:$0xff] }
  0x1a   :  { %758 = vmatpush3.bf16.msra.mxu0 %v757_v14  ;;  %163 = vmatprep.mubr.f32.mxu0 %v59_v26  ;;  %v171_v28 = vld [vmem:[%s1260_s4 + $0x8] sm:$0xff]  ;;  %v86_v36 = vld [vmem:[%s1258_s2 + $0xd0] sm:$0xff]  ;;  %v87_v37 = vld [vmem:[%s1258_s2 + $0xd8] sm:$0xff]  ;;  %v787_v38 = vpack.c.bf16 %v173_v35, %v172_v31 }
  0x1b   :  { %760 = vmatprep.subr.bf16.mxu0 %v759_v15  ;;  %v784_v30 = vpack.c.bf16 %v171_v28, %v170_v27  ;;  %v69_v34 = vld [vmem:[%s1258_s2 + $0x48] sm:$0xff]  ;;  %v174_v39 = vld [vmem:[%s1260_s4 + $0x20] sm:$0xff]  ;;  %v771_v42 = vpack.c.bf16 %v87_v37, %v86_v36  ;;  %v70_v43 = vld [vmem:[%s1258_s2 + $0x50] sm:$0xff]  ;;  %v913_v36 = vmov 0.0  }
  0x1c   :  { %v175_v40 = vld [vmem:[%s1260_s4 + $0x28] sm:$0xff]  ;;  %v769_v41 = vpack.c.bf16 %v69_v34, %v68_v33  ;;  %v71_v44 = vld [vmem:[%s1258_s2 + $0x58] sm:$0xff]  ;;  %v88_v45 = vld [vmem:[%s1258_s2 + $0xe0] sm:$0xff]  ;;  %706 = vmatprep.mubr.msk.f32.mxu1 %vm912_vm0, %v913_v36 }
  0x1d   :  { %785 = vmatpush3.bf16.msra.mxu1 %v784_v30  ;;  %v89_v46 = vld [vmem:[%s1258_s2 + $0xe8] sm:$0xff]  ;;  %v790_v47 = vpack.c.bf16 %v175_v40, %v174_v39  ;;  %v176_v48 = vld [vmem:[%s1260_s4 + $0x30] sm:$0xff]  ;;  %v177_v49 = vld [vmem:[%s1260_s4 + $0x38] sm:$0xff]  ;;  %v773_v50 = vpack.c.bf16 %v71_v44, %v70_v43 }
  0x1e   :  { %762 = vmatpush3.bf16.msra.mxu0 %v761_v20  ;;  %786 = vmatprep.subr.bf16.mxu1 %v911_v0  ;;  %v775_v51 = vpack.c.bf16 %v89_v46, %v88_v45  ;;  %v72_v52 = vld [vmem:[%s1258_s2 + $0x60] sm:$0xff]  ;;  %v73_v53 = vld [vmem:[%s1258_s2 + $0x68] sm:$0xff]  ;;  %v90_v54 = vld [vmem:[%s1258_s2 + $0xf0] sm:$0xff]  ;;  %v793_v56 = vpack.c.bf16 %v177_v49, %v176_v48 }
  0x1f   :  { %764 = vmatprep.subr.bf16.mxu0 %v763_v21  ;;  %v91_v55 = vld [vmem:[%s1258_s2 + $0xf8] sm:$0xff]  ;;  %v178_v57 = vld [vmem:[%s1260_s4 + $0x40] sm:$0xff]  ;;  %v179_v58 = vld [vmem:[%s1260_s4 + $0x48] sm:$0xff]  ;;  %v777_v59 = vpack.c.bf16 %v73_v53, %v72_v52 }
  0x20   :  { %v779_v60 = vpack.c.bf16 %v91_v55, %v90_v54  ;;  %v74_v61 = vld [vmem:[%s1258_s2 + $0x70] sm:$0xff]  ;;  %v75_v62 = vld [vmem:[%s1258_s2 + $0x78] sm:$0xff]  ;;  %v796_v63 = vpack.c.bf16 %v179_v58, %v178_v57  ;;  %v263_v4 = vld [vmem:[%s1262_s6] sm:$0xff] }
  0x21   :  { %788 = vmatpush3.bf16.msra.mxu1 %v787_v38  ;;  %v180_v1 = vld [vmem:[%s1260_s4 + $0x50] sm:$0xff]  ;;  %v181_v2 = vld [vmem:[%s1260_s4 + $0x58] sm:$0xff]  ;;  %v781_v3 = vpack.c.bf16 %v75_v62, %v74_v61  ;;  %v264_v5 = vld [vmem:[%s1262_s6 + $0x8] sm:$0xff] }
  0x22   :  { %766 = vmatpush3.bf16.msra.mxu0 %v765_v29  ;;  %789 = vmatprep.subr.bf16.mxu1 %v911_v0  ;;  %v799_v6 = vpack.c.bf16 %v181_v2, %v180_v1  ;;  %v58_v7 = vld [vmem:[%s1256_s0] sm:$0xff]  ;;  %v808_v8 = vpack.c.bf16 %v264_v5, %v263_v4  ;;  %v265_v9 = vld [vmem:[%s1262_s6 + $0x10] sm:$0xff]  ;;  %v266_v10 = vld [vmem:[%s1262_s6 + $0x18] sm:$0xff] }
  0x23   :  { %768 = vmatprep.subr.bf16.mxu0 %v767_v32  ;;  %v811_v11 = vpack.c.bf16 %v266_v10, %v265_v9  ;;  %v267_v12 = vld [vmem:[%s1262_s6 + $0x20] sm:$0xff]  ;;  %v268_v13 = vld [vmem:[%s1262_s6 + $0x28] sm:$0xff]  ;;  %v269_v15 = vld [vmem:[%s1262_s6 + $0x30] sm:$0xff] }
  0x24   :  { %v814_v14 = vpack.c.bf16 %v268_v13, %v267_v12  ;;  %v270_v16 = vld [vmem:[%s1262_s6 + $0x38] sm:$0xff]  ;;  %v271_v18 = vld [vmem:[%s1262_s6 + $0x40] sm:$0xff]  ;;  %v272_v19 = vld [vmem:[%s1262_s6 + $0x48] sm:$0xff] }
  0x25   :  { %791 = vmatpush3.bf16.msra.mxu1 %v790_v47  ;;  %v817_v17 = vpack.c.bf16 %v270_v16, %v269_v15  ;;  %v820_v20 = vpack.c.bf16 %v272_v19, %v271_v18  ;;  %v273_v21 = vld [vmem:[%s1262_s6 + $0x50] sm:$0xff]  ;;  %v274_v22 = vld [vmem:[%s1262_s6 + $0x58] sm:$0xff]  ;;  %v182_v24 = vld [vmem:[%s1260_s4 + $0x60] sm:$0xff] }
  0x26   :  { %770 = vmatpush3.bf16.msra.mxu0 %v769_v41  ;;  %792 = vmatprep.subr.bf16.mxu1 %v911_v0  ;;  %v823_v23 = vpack.c.bf16 %v274_v22, %v273_v21  ;;  %v183_v25 = vld [vmem:[%s1260_s4 + $0x68] sm:$0xff]  ;;  %v275_v26 = vld [vmem:[%s1262_s6 + $0x60] sm:$0xff]  ;;  %v184_v30 = vld [vmem:[%s1260_s4 + $0x70] sm:$0xff] }
  0x27   :  { %772 = vmatprep.subr.bf16.mxu0 %v771_v42  ;;  %v802_v27 = vpack.c.bf16 %v183_v25, %v182_v24  ;;  %v276_v28 = vld [vmem:[%s1262_s6 + $0x68] sm:$0xff]  ;;  %v185_v31 = vld [vmem:[%s1260_s4 + $0x78] sm:$0xff]  ;;  %v277_v32 = vld [vmem:[%s1262_s6 + $0x70] sm:$0xff] }
  0x28   :  { %v826_v29 = vpack.c.bf16 %v276_v28, %v275_v26  ;;  %v805_v33 = vpack.c.bf16 %v185_v31, %v184_v30  ;;  %v278_v34 = vld [vmem:[%s1262_s6 + $0x78] sm:$0xff]  ;;  %v594_v38 = vld [vmem:[%s1259_s3] ss:$0 sm:$0xff]  ;;  %v363_v43 = vld [vmem:[%s1264_s8 + $0x8] sm:$0x3] }
  0x29   :  { %794 = vmatpush3.bf16.msra.mxu1 %v793_v56  ;;  %v829_v35 = vpack.c.bf16 %v278_v34, %v277_v32  ;;  %vm833_vm3 = vmpackc.low %vm375_vm1, %vm914_vm2  ;;  %v451_v45 = vld [vmem:[#allocation2 + $0x8] sm:$0xff]  ;;  %v453_v46 = vld [vmem:[#allocation2 + $0x18] sm:$0xff] }
  0x2a   :  { %774 = vmatpush3.bf16.msra.mxu0 %v773_v50  ;;  %795 = vmatprep.subr.bf16.mxu1 %v911_v0  ;;  %v835_v47 = vpack.c.bf16 %v453_v46, %v451_v45  ;;  %v595_v48 = vld [vmem:[%s1261_s5] ss:$0 sm:$0xff]  ;;  %v455_v62 = vld [vmem:[#allocation2 + $0x28] sm:$0xff]  ;;  %v460_v12 = vld [vmem:[#allocation2 + $0x50] sm:$0xff] }
  0x2b   :  { %776 = vmatprep.subr.bf16.mxu0 %v775_v51  ;;  %v596_v49 = vld [vmem:[%s1263_s7] ss:$0 sm:$0xff]  ;;  %v463_v13 = vld [vmem:[#allocation2 + $0x68] sm:$0xff]  ;;  %v464_v18 = vld [vmem:[#allocation2 + $0x70] sm:$0xff] }
  0x2c   :  { %v356_v58 = vld [vmem:[%s1257_s1] sm:$0xff]  ;;  %v467_v19 = vld [vmem:[#allocation2 + $0x88] sm:$0xff]  ;;  %v468_v24 = vld [vmem:[#allocation2 + $0x90] sm:$0xff] }
  0x2d   :  { %797 = vmatpush3.bf16.msra.mxu1 %v796_v63  ;;  %v457_v63 = vld [vmem:[#allocation2 + $0x38] sm:$0xff]  ;;  %v454_v5 = vld [vmem:[#allocation2 + $0x20] sm:$0xff]  ;;  %v471_v25 = vld [vmem:[#allocation2 + $0xa8] sm:$0xff] }
  0x2e   :  { %778 = vmatpush3.bf16.msra.mxu0 %v777_v59  ;;  %798 = vmatprep.subr.bf16.mxu1 %v911_v0  ;;  %v450_v59 = vld [vmem:[#allocation2] sm:$0xff]  ;;  %v839_v4 = vpack.c.bf16 %v457_v63, %v455_v62  ;;  %v473_v26 = vld [vmem:[#allocation2 + $0xb8] sm:$0xff]  ;;  %v472_v30 = vld [vmem:[#allocation2 + $0xb0] sm:$0xff] }
  0x2f   :  { %780 = vmatprep.subr.bf16.mxu0 %v779_v60  ;;  %v452_v60 = vld [vmem:[#allocation2 + $0x10] sm:$0xff]  ;;  %v855_v28 = vpack.c.bf16 %v473_v26, %v471_v25  ;;  %v475_v31 = vld [vmem:[#allocation2 + $0xc8] sm:$0xff]  ;;  %v477_v32 = vld [vmem:[#allocation2 + $0xd8] sm:$0xff] }
  0x30   :  { %v837_v2 = vpack.c.bf16 %v452_v60, %v450_v59  ;;  %v859_v34 = vpack.c.bf16 %v477_v32, %v475_v31 }
  0x31   :  { %800 = vmatpush3.bf16.msra.mxu1 %v799_v6  ;;  %v456_v6 = vld [vmem:[#allocation2 + $0x30] sm:$0xff] }
  0x32   :  { %782 = vmatpush3.bf16.msra.mxu0 %v781_v3  ;;  %801 = vmatprep.subr.bf16.mxu1 %v911_v0  ;;  %v841_v9 = vpack.c.bf16 %v456_v6, %v454_v5 }
  0x33   :  { %807 = vmatprep.subr.bf16.mxu0 %v911_v0 }
  0x35   :  { %164 = vmatmul.mubr.f32.vlgmr.msra.gmra.mrb[0].mxu0 %v58_v7  ;;  %803 = vmatpush3.bf16.msra.mxu1 %v802_v27  ;;  %v459_v7 = vld [vmem:[#allocation2 + $0x48] sm:$0xff] }
  0x36   :  { %809 = vmatpush3.bf16.msra.mxu0 %v808_v8  ;;  %804 = vmatprep.subr.bf16.mxu1 %v911_v0  ;;  %v461_v8 = vld [vmem:[#allocation2 + $0x58] sm:$0xff] }
  0x37   :  { %810 = vmatprep.subr.bf16.mxu0 %v911_v0  ;;  %741 = vmatprep.mubr.msk.f32.mxu0 %vm912_vm0, %v913_v36  ;;  %v843_v10 = vpack.c.bf16 %v461_v8, %v459_v7 }
  0x39   :  { %806 = vmatpush3.bf16.msra.mxu1 %v805_v33 }
  0x3a   :  { %812 = vmatpush3.bf16.msra.mxu0 %v811_v11  ;;  %831 = vmatprep.subr.bf16.mxu1 %v911_v0  ;;  %v458_v11 = vld [vmem:[#allocation2 + $0x40] sm:$0xff] }
  0x3b   :  { %813 = vmatprep.subr.bf16.mxu0 %v911_v0  ;;  %v845_v15 = vpack.c.bf16 %v460_v12, %v458_v11 }
  0x3e   :  { %815 = vmatpush3.bf16.msra.mxu0 %v814_v14  ;;  %v465_v14 = vld [vmem:[#allocation2 + $0x78] sm:$0xff] }
  0x3f   :  { %816 = vmatprep.subr.bf16.mxu0 %v911_v0  ;;  %v847_v16 = vpack.c.bf16 %v465_v14, %v463_v13 }
  0x42   :  { %818 = vmatpush3.bf16.msra.mxu0 %v817_v17  ;;  %v462_v17 = vld [vmem:[#allocation2 + $0x60] sm:$0xff] }
  0x43   :  { %819 = vmatprep.subr.bf16.mxu0 %v911_v0  ;;  %v849_v21 = vpack.c.bf16 %v464_v18, %v462_v17 }
  0x46   :  { %821 = vmatpush3.bf16.msra.mxu0 %v820_v20  ;;  %v469_v20 = vld [vmem:[#allocation2 + $0x98] sm:$0xff] }
  0x47   :  { %822 = vmatprep.subr.bf16.mxu0 %v911_v0  ;;  %v851_v22 = vpack.c.bf16 %v469_v20, %v467_v19 }
  0x4a   :  { %824 = vmatpush3.bf16.msra.mxu0 %v823_v23  ;;  %v466_v23 = vld [vmem:[#allocation2 + $0x80] sm:$0xff] }
  0x4b   :  { %825 = vmatprep.subr.bf16.mxu0 %v911_v0  ;;  %v853_v27 = vpack.c.bf16 %v468_v24, %v466_v23 }
  0x4e   :  { %827 = vmatpush3.bf16.msra.mxu0 %v826_v29  ;;  %v470_v29 = vld [vmem:[#allocation2 + $0xa0] sm:$0xff] }
  0x4f   :  { %828 = vmatprep.subr.bf16.mxu0 %v911_v0  ;;  %v362_v0 = vld [vmem:[%s1264_s8] sm:$0xff]  ;;  %v857_v33 = vpack.c.bf16 %v472_v30, %v470_v29 }
  0x50   :  { %v832_v44 = vpack.c.bf16 %v363_v43, %v362_v0  ;;  %v597_v43 = vld [vmem:[%s1265_s9] ss:$0 sm:$0xff] }
  0x52   :  { %830 = vmatpush3.bf16.msra.mxu0 %v829_v35  ;;  %v474_v35 = vld [vmem:[#allocation2 + $0xc0] sm:$0xff] }
 0x108   :  { %v634_v37 = vpop.f32.mrb[0].mxu0 }
 0x109   :  { %v635_v39 = vpop.f32.mrb[1].mxu0 }
 0x10a   :  { %v636_v40 = vadd.f32 %v635_v39, %v634_v37  ;;  %v481_v39 = vld [vmem:[#allocation2 + $0xf8] sm:$0xff] }
 0x10c   :  { %v166_v41 = vadd.f32 %v636_v40, %v594_v38  ;;  %v479_v38 = vld [vmem:[#allocation2 + $0xe8] sm:$0xff] }
 0x10d   :  { %v863_v40 = vpack.c.bf16 %v481_v39, %v479_v38 }
 0x10e   :  { %v169_v42 = vmax.f32 %v166_v41, 0.0  ;;  %v478_v41 = vld [vmem:[#allocation2 + $0xe0] sm:$0xff] }
 0x110   :  { %707 = vmatmul.mubr.f32.vlgmr.msra.gmra.mrb[0].mxu1 %v169_v42  ;;  %742 = vmatmul.mubr.f32.vlgmr.msra.gmra.mrb[2].mxu0 %v169_v42  ;;  %v480_v42 = vld [vmem:[#allocation2 + $0xf0] sm:$0xff] }
 0x111   :  { %748 = vmatprep.mubr.msk.f32.mxu1 %vm912_vm0, %v913_v36  ;;  %834 = vmatpush3.bf16.msk.msra.mxu1 %vm833_vm3, %v832_v44  ;;  %v865_v0 = vpack.c.bf16 %v480_v42, %v478_v41 }
 0x112   :  { %836 = vmatprep.subr.bf16.mxu1 %v835_v47 }
 0x1e3   :  { %v259_v50 = vpop.f32.mrb[0].mxu1  ;;  %v352_v51 = vpop.f32.mrb[2].mxu0 }
 0x1e4   :  { %v260_v52 = vadd.f32 %v595_v48, %v259_v50  ;;  %v353_v53 = vadd.f32 %v596_v49, %v352_v51  ;;  %v708_v54 = vpop.f32.mrb[1].mxu1  ;;  %v743_v55 = vpop.f32.mrb[3].mxu0  ;;  %v484_v48 = vlaneseq  ;;  %v482_v51 = vld [vmem:[%s1267_s11] sm:$0x3] }
 0x1e6   :  { %579 = vst.msk [vmem:[%s1269_s13] sm:$0xff] %vm371_vm4, %v260_v52  ;;  %v357_v56 = vmul.f32 0.5, %v353_v53  ;;  %580 = vst.msk [vmem:[%s1270_s14] sm:$0xff] %vm371_vm4, %v353_v53  ;;  %v485_v49 = vshrl.u32 %v484_v48, 7 }
 0x1e8   :  { %v358_v57 = vmul.f32 1.442695, %v357_v56  ;;  %v486_v50 = vsub.s32 0, %v485_v49 }
 0x1ea   :  { %874 = vpow2.f32 %v358_v57  ;;  %v487_v53 = vrot.slane %v482_v51, %v486_v50 }
 0x1f4   :  { %v875_v61 = vpop.eup %874 }
 0x1f5   :  { %v360_v1 = vmul.f32 %v875_v61, %v356_v58 }
 0x1f7   :  { %v361_v3 = vadd.f32 %v360_v1, %v260_v52  ;;  %v490_v52 = vsub.s32 1, %v485_v49 }
 0x1f9   :  { %749 = vmatmul.mubr.msk.f32.vlgmr.msra.gmra.mrb[2].mxu1 %vm371_vm4, %v361_v3  ;;  %v491_v54 = vrot.slane %v482_v51, %v490_v52 }
 0x1fa   :  { %838 = vmatpush1.bf16.msra.mxu1 %v837_v2  ;;  %558 = vmatprep.mubr.f32.mxu1 %v913_v36  ;;  %v476_v36 = vld [vmem:[#allocation2 + $0xd0] sm:$0xff] }
 0x1fb   :  { %840 = vmatprep.subr.bf16.mxu1 %v839_v4  ;;  %v861_v37 = vpack.c.bf16 %v476_v36, %v474_v35 }
 0x1fe   :  { %842 = vmatpush1.bf16.msra.mxu1 %v841_v9 }
 0x1ff   :  { %844 = vmatprep.subr.bf16.mxu1 %v843_v10 }
 0x202   :  { %846 = vmatpush1.bf16.msra.mxu1 %v845_v15 }
 0x203   :  { %848 = vmatprep.subr.bf16.mxu1 %v847_v16 }
 0x206   :  { %850 = vmatpush1.bf16.msra.mxu1 %v849_v21 }
 0x207   :  { %852 = vmatprep.subr.bf16.mxu1 %v851_v22 }
 0x20a   :  { %854 = vmatpush1.bf16.msra.mxu1 %v853_v27 }
 0x20b   :  { %856 = vmatprep.subr.bf16.mxu1 %v855_v28 }
 0x20e   :  { %858 = vmatpush1.bf16.msra.mxu1 %v857_v33 }
 0x20f   :  { %860 = vmatprep.subr.bf16.mxu1 %v859_v34 }
 0x212   :  { %862 = vmatpush1.bf16.msra.mxu1 %v861_v37 }
 0x213   :  { %864 = vmatprep.subr.bf16.mxu1 %v863_v40 }
 0x216   :  { %866 = vmatpush1.bf16.msra.mxu1 %v865_v0 }
 0x2cc   :  { %v445_v44 = vpop.f32.mrb[2].mxu1 }
 0x2cd   :  { %v446_v45 = vadd.f32 %v597_v43, %v445_v44  ;;  %v750_v46 = vpop.f32.mrb[3].mxu1 }
 0x2cf   :  { %v449_v47 = vmax.f32 %v446_v45, 0.0 }
 0x2d1   :  { %559 = vmatmul.mubr.f32.vlgmr.msra.gmra.mrb[4].mxu1 %v449_v47 }
 0x3a4   :  { %v560_v55 = vpop.f32.mrb[4].mxu1 }
 0x3a5   :  { %v561_v56 = vadd.f32 %v560_v55, %v487_v53  ;;  %v562_v57 = vpop.f32.mrb[5].mxu1 }
 0x3a6   :  { %v563_v58 = vadd.f32 %v562_v57, %v491_v54 }
 0x3a7   :  { %v600_v59 = vmul.f32 -1.442695, %v561_v56 }
 0x3a8   :  { %v601_v60 = vmul.f32 -1.442695, %v563_v58 }
 0x3a9   :  { %876 = vpow2.f32 %v600_v59 }
 0x3aa   :  { %878 = vpow2.f32 %v601_v60 }
 0x3b3   :  { %v877_v61 = vpop.eup %876 }
 0x3b4   :  { %v879_v62 = vpop.eup %878  ;;  %v571_v63 = vadd.f32 1.0, %v877_v61 }
 0x3b5   :  { %v572_v1 = vadd.f32 1.0, %v879_v62 }
 0x3b6   :  { %880 = vrcp.f32 %v571_v63 }
 0x3b7   :  { %882 = vrcp.f32 %v572_v1 }
 0x3c0   :  { %v881_v2 = vpop.eup %880 }
 0x3c1   :  { %v883_v3 = vpop.eup %882  ;;  %577 = vst [vmem:[%s1268_s12] sm:$0xff] %v881_v2 }
 0x3c2   :  { %578 = vst [vmem:[%s1268_s12 + $0x8] sm:$0xff] %v883_v3 }
 0x3c3   :  { %593 = vsyncpa [#allocation3], 1 }

</bundles_post_ra>
